<compile_context>
chip_gen: v5e
topology: v5e:2x2
jax: 0.10.0
libtpu: 0.0.40
codegen_flags: <defaults>
</compile_context>

<pallas_src>
import jax
import jax.numpy as jnp
from jax.experimental import pallas as pl
from jax.experimental.pallas import tpu as pltpu

# Static problem sizes implied by the module: Linear(2, 3) applied to (2, 2).
B, IN, OUT = 2, 2, 3


def _fused_linear_flatten_kernel(p_ref, o_ref):
    """p_ref: (B*IN + OUT*IN + OUT,) f32 in SMEM, packed as [x | w | b]
         x[i, m]  at p_ref[i*IN + m]
         w[j, m]  at p_ref[B*IN + j*IN + m]   (PyTorch Linear layout, no transpose)
         b[j]     at p_ref[B*IN + OUT*IN + j]
       o_ref: (1, B*OUT) f32 in SMEM -- the final flattened + stacked result.

    out[0, i*OUT + j] = b[j] + sum_m x[i, m] * w[j, m]
    Fully unrolled scalar path: 12 MACs + 6 scalar stores on SMEM.
    """
    x_off = 0
    w_off = B * IN
    b_off = w_off + OUT * IN
    for i in range(B):
        for j in range(OUT):
            val = p_ref[b_off + j]
            for m in range(IN):
                val = val + p_ref[x_off + i * IN + m] * p_ref[w_off + j * IN + m]
            o_ref[0, i * OUT + j] = val


def model_forward(x, weight, bias):
    """x: (B, IN) f32, weight: (OUT, IN) f32 (PyTorch layout), bias: (OUT,) f32.
    Returns the module output: shape (1, B*OUT)."""
    # Pack everything into one tiny SMEM operand -> a single input transfer.
    packed = jnp.concatenate(
        [x.reshape(-1), weight.reshape(-1), bias.reshape(-1)]
    ).astype(jnp.float32)

    return pl.pallas_call(
        _fused_linear_flatten_kernel,
        out_shape=jax.ShapeDtypeStruct((1, B * OUT), jnp.float32),
        in_specs=[pl.BlockSpec(memory_space=pltpu.MemorySpace.SMEM)],
        out_specs=pl.BlockSpec(memory_space=pltpu.MemorySpace.SMEM),
        cost_estimate=pl.CostEstimate(
            flops=2 * B * IN * OUT,
            transcendentals=0,
            bytes_accessed=(B * IN + OUT * IN + OUT + B * OUT) * 4,
        ),
        # No grid, no dimension_semantics: 12 FLOPs, single TensorCore.
    )(packed)


if __name__ == "__main__":
    key = jax.random.PRNGKey(0)
    kx, kw, kb = jax.random.split(key, 3)

    # Input consistent with the module: x = torch.randn(2, 2)
    x = jax.random.normal(kx, (B, IN), dtype=jnp.float32)

    # Deterministic Linear(2, 3) params, PyTorch-style uniform(-1/sqrt(in), 1/sqrt(in)).
    bound = float(IN) ** -0.5
    weight = jax.random.uniform(kw, (OUT, IN), minval=-bound, maxval=bound,
                                dtype=jnp.float32)
    bias = jax.random.uniform(kb, (OUT,), minval=-bound, maxval=bound,
                              dtype=jnp.float32)

    out = jax.jit(model_forward)(x, weight, bias)
    jax.block_until_ready(out)

    # Sanity check against plain-JAX reference (Linear -> flatten -> stack).
    ref = (x @ weight.T + bias).reshape(1, B * OUT)
    assert out.shape == (1, B * OUT)
    assert jnp.allclose(out, ref, atol=1e-5, rtol=1e-5)

    print("KERNEL_OK")
</pallas_src>

<mosaic_0001>
module attributes {stable_mosaic.version = 11 : i64} {
  func.func @_fused_linear_flatten_kernel(%arg0: memref<13xf32, #tpu.memory_space<smem>>, %arg1: memref<1x6xf32, #tpu.memory_space<smem>>) attributes {dimension_semantics = [], scalar_prefetch = 0 : i64, scratch_operands = 0 : i64, tpu.core_type = #tpu.core_type<tc>} {
    %c10 = arith.constant 10 : index
    %0 = memref.load %arg0[%c10] : memref<13xf32, #tpu.memory_space<smem>>
    %c0 = arith.constant 0 : index
    %1 = memref.load %arg0[%c0] : memref<13xf32, #tpu.memory_space<smem>>
    %c4 = arith.constant 4 : index
    %2 = memref.load %arg0[%c4] : memref<13xf32, #tpu.memory_space<smem>>
    %3 = arith.mulf %1, %2 : f32
    %4 = arith.addf %0, %3 : f32
    %c1 = arith.constant 1 : index
    %5 = memref.load %arg0[%c1] : memref<13xf32, #tpu.memory_space<smem>>
    %c5 = arith.constant 5 : index
    %6 = memref.load %arg0[%c5] : memref<13xf32, #tpu.memory_space<smem>>
    %7 = arith.mulf %5, %6 : f32
    %8 = arith.addf %4, %7 : f32
    %c0_0 = arith.constant 0 : index
    %c0_1 = arith.constant 0 : index
    %9 = memref.load %arg1[%c0_0, %c0_1] : memref<1x6xf32, #tpu.memory_space<smem>>
    memref.store %8, %arg1[%c0_0, %c0_1] : memref<1x6xf32, #tpu.memory_space<smem>>
    %c11 = arith.constant 11 : index
    %10 = memref.load %arg0[%c11] : memref<13xf32, #tpu.memory_space<smem>>
    %c0_2 = arith.constant 0 : index
    %11 = memref.load %arg0[%c0_2] : memref<13xf32, #tpu.memory_space<smem>>
    %c6 = arith.constant 6 : index
    %12 = memref.load %arg0[%c6] : memref<13xf32, #tpu.memory_space<smem>>
    %13 = arith.mulf %11, %12 : f32
    %14 = arith.addf %10, %13 : f32
    %c1_3 = arith.constant 1 : index
    %15 = memref.load %arg0[%c1_3] : memref<13xf32, #tpu.memory_space<smem>>
    %c7 = arith.constant 7 : index
    %16 = memref.load %arg0[%c7] : memref<13xf32, #tpu.memory_space<smem>>
    %17 = arith.mulf %15, %16 : f32
    %18 = arith.addf %14, %17 : f32
    %c0_4 = arith.constant 0 : index
    %c1_5 = arith.constant 1 : index
    %19 = memref.load %arg1[%c0_4, %c1_5] : memref<1x6xf32, #tpu.memory_space<smem>>
    memref.store %18, %arg1[%c0_4, %c1_5] : memref<1x6xf32, #tpu.memory_space<smem>>
    %c12 = arith.constant 12 : index
    %20 = memref.load %arg0[%c12] : memref<13xf32, #tpu.memory_space<smem>>
    %c0_6 = arith.constant 0 : index
    %21 = memref.load %arg0[%c0_6] : memref<13xf32, #tpu.memory_space<smem>>
    %c8 = arith.constant 8 : index
    %22 = memref.load %arg0[%c8] : memref<13xf32, #tpu.memory_space<smem>>
    %23 = arith.mulf %21, %22 : f32
    %24 = arith.addf %20, %23 : f32
    %c1_7 = arith.constant 1 : index
    %25 = memref.load %arg0[%c1_7] : memref<13xf32, #tpu.memory_space<smem>>
    %c9 = arith.constant 9 : index
    %26 = memref.load %arg0[%c9] : memref<13xf32, #tpu.memory_space<smem>>
    %27 = arith.mulf %25, %26 : f32
    %28 = arith.addf %24, %27 : f32
    %c0_8 = arith.constant 0 : index
    %c2 = arith.constant 2 : index
    %29 = memref.load %arg1[%c0_8, %c2] : memref<1x6xf32, #tpu.memory_space<smem>>
    memref.store %28, %arg1[%c0_8, %c2] : memref<1x6xf32, #tpu.memory_space<smem>>
    %c10_9 = arith.constant 10 : index
    %30 = memref.load %arg0[%c10_9] : memref<13xf32, #tpu.memory_space<smem>>
    %c2_10 = arith.constant 2 : index
    %31 = memref.load %arg0[%c2_10] : memref<13xf32, #tpu.memory_space<smem>>
    %c4_11 = arith.constant 4 : index
    %32 = memref.load %arg0[%c4_11] : memref<13xf32, #tpu.memory_space<smem>>
    %33 = arith.mulf %31, %32 : f32
    %34 = arith.addf %30, %33 : f32
    %c3 = arith.constant 3 : index
    %35 = memref.load %arg0[%c3] : memref<13xf32, #tpu.memory_space<smem>>
    %c5_12 = arith.constant 5 : index
    %36 = memref.load %arg0[%c5_12] : memref<13xf32, #tpu.memory_space<smem>>
    %37 = arith.mulf %35, %36 : f32
    %38 = arith.addf %34, %37 : f32
    %c0_13 = arith.constant 0 : index
    %c3_14 = arith.constant 3 : index
    %39 = memref.load %arg1[%c0_13, %c3_14] : memref<1x6xf32, #tpu.memory_space<smem>>
    memref.store %38, %arg1[%c0_13, %c3_14] : memref<1x6xf32, #tpu.memory_space<smem>>
    %c11_15 = arith.constant 11 : index
    %40 = memref.load %arg0[%c11_15] : memref<13xf32, #tpu.memory_space<smem>>
    %c2_16 = arith.constant 2 : index
    %41 = memref.load %arg0[%c2_16] : memref<13xf32, #tpu.memory_space<smem>>
    %c6_17 = arith.constant 6 : index
    %42 = memref.load %arg0[%c6_17] : memref<13xf32, #tpu.memory_space<smem>>
    %43 = arith.mulf %41, %42 : f32
    %44 = arith.addf %40, %43 : f32
    %c3_18 = arith.constant 3 : index
    %45 = memref.load %arg0[%c3_18] : memref<13xf32, #tpu.memory_space<smem>>
    %c7_19 = arith.constant 7 : index
    %46 = memref.load %arg0[%c7_19] : memref<13xf32, #tpu.memory_space<smem>>
    %47 = arith.mulf %45, %46 : f32
    %48 = arith.addf %44, %47 : f32
    %c0_20 = arith.constant 0 : index
    %c4_21 = arith.constant 4 : index
    %49 = memref.load %arg1[%c0_20, %c4_21] : memref<1x6xf32, #tpu.memory_space<smem>>
    memref.store %48, %arg1[%c0_20, %c4_21] : memref<1x6xf32, #tpu.memory_space<smem>>
    %c12_22 = arith.constant 12 : index
    %50 = memref.load %arg0[%c12_22] : memref<13xf32, #tpu.memory_space<smem>>
    %c2_23 = arith.constant 2 : index
    %51 = memref.load %arg0[%c2_23] : memref<13xf32, #tpu.memory_space<smem>>
    %c8_24 = arith.constant 8 : index
    %52 = memref.load %arg0[%c8_24] : memref<13xf32, #tpu.memory_space<smem>>
    %53 = arith.mulf %51, %52 : f32
    %54 = arith.addf %50, %53 : f32
    %c3_25 = arith.constant 3 : index
    %55 = memref.load %arg0[%c3_25] : memref<13xf32, #tpu.memory_space<smem>>
    %c9_26 = arith.constant 9 : index
    %56 = memref.load %arg0[%c9_26] : memref<13xf32, #tpu.memory_space<smem>>
    %57 = arith.mulf %55, %56 : f32
    %58 = arith.addf %54, %57 : f32
    %c0_27 = arith.constant 0 : index
    %c5_28 = arith.constant 5 : index
    %59 = memref.load %arg1[%c0_27, %c5_28] : memref<1x6xf32, #tpu.memory_space<smem>>
    memref.store %58, %arg1[%c0_27, %c5_28] : memref<1x6xf32, #tpu.memory_space<smem>>
    return
  }
}

</mosaic_0001>

<bundles_post_ra>
// kernel: model_forward.1
= control target key start
LH: loop header
LB: loop body
LE: loop exit
PB: predicated region body
PF: predicated region fallthrough
CT: control target
= control target key end

     0   :  { %6 = vsyncpa [#allocation4], 0  ;;  %s203_s0 = inlined_call_operand.vmem [shape: f32[13], index: 0, kind: input, shape index: {}]   ;;  %s204_s1 = inlined_call_operand.hbm [shape: f32[1,6], index: 1, kind: output, shape index: {}]  }
   0x1   :  { %7 = vsyncpa [#allocation3], 0  ;;  %s13_s8 = sshll.u32 %s203_s0, 4  ;;  %s161_s9 = smov [#allocation2]   ;;  %s14_s8 = int_to_ptr.vmem [resolvable:$true] %s13_s8 }
   0x2   :  { %16 = dma.vmem_to_smem %s14_s8, 16, %s161_s9, [#allocation4]  }
   0x3   :  { %157 = dma.done.wait [#allocation4], 16  }
   0x4   :  { %158 = vsyncadd [#allocation4], 4294967280 }
   0x5   :  { %21 = sfence }
   0x6   :  { %s176_s10 = sld [smem:[#allocation2 + $0xa]] }
   0x7   :  { %s23_s11 = sld [smem:[#allocation2]] }
   0x8   :  { %s105_s12 = sld [smem:[#allocation2 + $0x4]] }
   0x9   :  { %s106_s13 = sld [smem:[#allocation2 + $0x1]] }
   0xa   :  { %s178_s14 = sld [smem:[#allocation2 + $0x5]] }
   0xb   :  { %s108_s15 = sld [smem:[#allocation2 + $0xb]] }
   0xc   :  { %s109_s16 = sld [smem:[#allocation2 + $0x6]] }
   0xd   :  { %s180_s17 = sld [smem:[#allocation2 + $0x7]] }
   0xe   :  { %s25_s0 = smul.f32 %s105_s12, %s23_s11  ;;  %s182_s18 = sld [smem:[#allocation2 + $0xc]] }
   0xf   :  { %s184_s19 = sld [smem:[#allocation2 + $0x8]] }
  0x10   :  { %s26_s20 = sadd.f32 %s176_s10, %s25_s0  ;;  %s29_s21 = smul.f32 %s178_s14, %s106_s13 }
  0x11   :  { %s188_s22 = sld [smem:[#allocation2 + $0x9]] }
  0x12   :  { %s30_s23 = sadd.f32 %s29_s21, %s26_s20  ;;  %s36_s24 = smul.f32 %s109_s16, %s23_s11 }
  0x13   :  { %s40_s25 = smul.f32 %s180_s17, %s106_s13  ;;  %s117_s26 = sld [smem:[#allocation2 + $0x2]] }
  0x14   :  { %32 = sst [smem:[#allocation5]] %s30_s23 }
  0x15   :  { %s37_s27 = sadd.f32 %s108_s15, %s36_s24  ;;  %s47_s28 = smul.f32 %s184_s19, %s23_s11 }
  0x16   :  { %s119_s29 = sld [smem:[#allocation2 + $0x3]] }
  0x17   :  { %s41_s30 = sadd.f32 %s40_s25, %s37_s27  ;;  %s51_s2 = smul.f32 %s188_s22, %s106_s13 }
  0x18   :  { %s48_s3 = sadd.f32 %s182_s18, %s47_s28  ;;  %s93_s25 = sshll.u32 %s204_s1, 4  ;;  %s94_s25 = int_to_ptr.hbm [resolvable:$true] %s93_s25 }
  0x19   :  { %43 = sst [smem:[#allocation5 + $0x1]] %s41_s30  ;;  %s58_s4 = smul.f32 %s117_s26, %s105_s12 }
  0x1a   :  { %s52_s5 = sadd.f32 %s51_s2, %s48_s3  ;;  %s69_s6 = smul.f32 %s117_s26, %s109_s16 }
  0x1b   :  { %s59_s7 = sadd.f32 %s176_s10, %s58_s4  ;;  %s80_s21 = smul.f32 %s117_s26, %s184_s19 }
  0x1c   :  { %54 = sst [smem:[#allocation5 + $0x2]] %s52_s5  ;;  %s62_s8 = smul.f32 %s119_s29, %s178_s14 }
  0x1d   :  { %s70_s9 = sadd.f32 %s108_s15, %s69_s6  ;;  %s73_s0 = smul.f32 %s119_s29, %s180_s17 }
  0x1e   :  { %s63_s20 = sadd.f32 %s62_s8, %s59_s7  ;;  %s84_s13 = smul.f32 %s119_s29, %s188_s22 }
  0x1f   :  { %s74_s23 = sadd.f32 %s73_s0, %s70_s9  ;;  %s162_s16 = smov [#allocation5]  }
  0x20   :  { %65 = sst [smem:[#allocation5 + $0x3]] %s63_s20 }
  0x21   :  { %76 = sst [smem:[#allocation5 + $0x4]] %s74_s23 }
  0x22   :  { %s81_s27 = sadd.f32 %s182_s18, %s80_s21 }
  0x24   :  { %s85_s12 = sadd.f32 %s84_s13, %s81_s27 }
  0x26   :  { %87 = sst [smem:[#allocation5 + $0x5]] %s85_s12 }
  0x27   :  { %96 = dma.smem_to_hbm %s162_s16, 16, %s94_s25, [#allocation3]  }
  0x28   :  { %159 = dma.done.wait [#allocation3], 16  }
  0x29   :  { %160 = vsyncadd [#allocation3], 4294967280 }
  0x2a   :  { %101 = sfence }
  0x2b   :  { %102 = vsyncpa [#allocation3], 1 }
  0x2c   :  { %103 = vsyncpa [#allocation4], 1 }

</bundles_post_ra>
